<compile_context>
chip_gen: v6e
topology: v6e:2x2x1
jax: 0.10.0
libtpu: 0.0.40
codegen_flags: <defaults>
</compile_context>

<pallas_src>
import jax
import jax.numpy as jnp
from jax.experimental import pallas as pl
from jax.experimental.pallas import tpu as pltpu


# --------------------------------------------------------------------------- #
# Hardware helpers
# --------------------------------------------------------------------------- #
def _round_up(v, m):
    return (v + m - 1) // m * m


def _tpu_generation():
    """Best-effort TPU generation (5/6/7) from the device kind string."""
    try:
        kind = jax.devices()[0].device_kind.lower()
    except Exception:
        return 6
    for g in (7, 6, 5, 4):
        if f"v{g}" in kind:
            return g
    return 6


def _vmem_capacity_bytes(gen):
    """Physical per-core VMEM (v7x: 64 MiB, v5e/v6e: 128 MiB)."""
    try:
        info = pltpu.get_tpu_info()
        for name in ("vmem_capacity_bytes", "vmem_size_bytes", "vmem_bytes"):
            v = getattr(info, name, None)
            if v:
                return int(v)
    except Exception:
        pass
    return (64 if gen >= 7 else 128) * 1024 * 1024


def _feat_align(d, gen):
    """Lane alignment: always a multiple of 128; on v6e/v7x (2x256x256 MXU)
    align non-tiny feature dims to 256 so each vmatmul fills the array."""
    if gen >= 6 and d > 128:
        return _round_up(d, 256)
    return _round_up(d, 128)


def _pick_tb(batch, gen):
    """Adaptive batch tile: 16-row granularity (legal for bf16/f32 sublane
    packing) so tiny batches don't pay 128x padded work; up to 256 rows on
    v6e/v7x to feed the 256-wide MXU M dimension for large batches."""
    big = 256 if gen >= 6 else 128
    return min(big, _round_up(max(batch, 1), 16))


# --------------------------------------------------------------------------- #
# One-time parameter preparation (hoisted out of the per-call hot path)
# --------------------------------------------------------------------------- #
def prepare_params(params, gen=None):
    """Pads + bf16-casts the 5 (w, b) pairs once.

    w: (in, out) f32  (transpose of torch's (out, in));  b: (1, out) f32.
    """
    if gen is None:
        gen = _tpu_generation()
    dims = [params[0][0].shape[0]] + [w.shape[1] for (w, _) in params]
    dims_pad = [_feat_align(d, gen) for d in dims]

    weights, biases = [], []
    for li, (w, b) in enumerate(params):
        din_p, dout_p = dims_pad[li], dims_pad[li + 1]
        w_pad = jnp.zeros((din_p, dout_p), jnp.bfloat16)
        w_pad = w_pad.at[:w.shape[0], :w.shape[1]].set(w.astype(jnp.bfloat16))
        b2 = jnp.asarray(b, jnp.float32).reshape(1, -1)
        b_pad = jnp.zeros((1, dout_p), jnp.float32).at[:, :b2.shape[1]].set(b2)
        weights.append(w_pad)
        biases.append(b_pad)

    return {"gen": gen, "dims": dims, "dims_pad": dims_pad,
            "weights": weights, "biases": biases}


# --------------------------------------------------------------------------- #
# Fused path: all 5 layers in one kernel, weights VMEM-resident
# --------------------------------------------------------------------------- #
def _fused_mlp_kernel(x_ref,
                      w1_ref, b1_ref, w2_ref, b2_ref, w3_ref, b3_ref,
                      w4_ref, b4_ref, w5_ref, b5_ref, o_ref):
    """(Linear -> ReLU) x 5 entirely in VMEM. bf16 MXU operands, f32 accumulate;
    bias add + ReLU in f32 on the VPU (safe on v5e, no bf16 VPU)."""

    def layer(h_bf16, w_ref, b_ref):
        y = jnp.dot(h_bf16, w_ref[...], preferred_element_type=jnp.float32)
        return jnp.maximum(y + b_ref[...], 0.0)   # (1, out) bias broadcasts over rows

    h = layer(x_ref[...], w1_ref, b1_ref)          # x is already bf16
    h = layer(h.astype(jnp.bfloat16), w2_ref, b2_ref)
    h = layer(h.astype(jnp.bfloat16), w3_ref, b3_ref)
    h = layer(h.astype(jnp.bfloat16), w4_ref, b4_ref)
    # torch BaseModel applies ReLU after the final Linear as well.
    h = layer(h.astype(jnp.bfloat16), w5_ref, b5_ref)
    o_ref[...] = h.astype(o_ref.dtype)


def _fused_forward(x_pad, prep, tb, use_buffered_weights):
    dims_pad = prep["dims_pad"]
    n_layers = len(prep["weights"])
    B_pad = x_pad.shape[0]
    grid = (B_pad // tb,)

    def resident_spec(shape):
        if use_buffered_weights:
            # Block index never changes -> single buffer (no implicit double
            # buffering) halves the resident-weight VMEM footprint.
            return pl.BlockSpec(shape, lambda i: (0, 0),
                                pipeline_mode=pl.Buffered(1))
        return pl.BlockSpec(shape, lambda i: (0, 0))

    in_specs = [pl.BlockSpec((tb, dims_pad[0]), lambda i: (i, 0))]
    flat_args = [x_pad]
    for li in range(n_layers):
        din_p, dout_p = dims_pad[li], dims_pad[li + 1]
        in_specs.append(resident_spec((din_p, dout_p)))   # resident weight
        in_specs.append(resident_spec((1, dout_p)))       # resident bias
        flat_args += [prep["weights"][li], prep["biases"][li]]
    out_specs = pl.BlockSpec((tb, dims_pad[-1]), lambda i: (i, 0))

    flops = 2 * B_pad * sum(dims_pad[i] * dims_pad[i + 1] for i in range(n_layers))
    w_bytes = sum(dims_pad[i] * dims_pad[i + 1] * 2 + dims_pad[i + 1] * 4
                  for i in range(n_layers))
    io_bytes = B_pad * dims_pad[0] * 2 + B_pad * dims_pad[-1] * 4
    cost = pl.CostEstimate(flops=flops, transcendentals=0,
                           bytes_accessed=w_bytes + io_bytes)

    wbuf = 1 if use_buffered_weights else 2
    vmem_needed = (wbuf * w_bytes
                   + 2 * tb * dims_pad[0] * 2        # double-buffered bf16 x tiles
                   + 2 * tb * dims_pad[-1] * 4       # double-buffered f32 out tiles
                   + 2 * tb * max(dims_pad) * 4)     # ~2 live f32 activation tiles
    budget = int(0.85 * _vmem_capacity_bytes(prep["gen"]))   # headroom for Mosaic scratch
    vmem_limit = int(min(budget, max(int(1.5 * vmem_needed), 4 * 1024 * 1024)))

    return pl.pallas_call(
        _fused_mlp_kernel,
        out_shape=jax.ShapeDtypeStruct((B_pad, dims_pad[-1]), jnp.float32),
        grid=grid,
        in_specs=in_specs,
        out_specs=out_specs,
        compiler_params=pltpu.CompilerParams(
            dimension_semantics=("parallel",),   # batch tiles shard across v7x's 2 TCs
            vmem_limit_bytes=vmem_limit),
        cost_estimate=cost,
    )(*flat_args)


# --------------------------------------------------------------------------- #
# Fallback path: weight-tiled per-layer matmul (+ bias + ReLU)
# --------------------------------------------------------------------------- #
def _linear_relu_kernel(x_ref, w_ref, b_ref, o_ref, acc_ref):
    @pl.when(pl.program_id(2) == 0)
    def _():
        acc_ref[...] = jnp.zeros_like(acc_ref)

    acc_ref[...] += jnp.dot(x_ref[...], w_ref[...],
                            preferred_element_type=jnp.float32)

    @pl.when(pl.program_id(2) == pl.num_programs(2) - 1)
    def _():
        o_ref[...] = jnp.maximum(acc_ref[...] + b_ref[...], 0.0).astype(o_ref.dtype)


def _pick_div_tile(dim, candidates=(512, 256, 128)):
    for t in candidates:
        if dim % t == 0:
            return t
    return dim


def _linear_relu(x_pad, w_pad, b_pad, out_dtype, tm):
    M, K = x_pad.shape
    N = w_pad.shape[1]
    tm = min(tm, M)
    tn = _pick_div_tile(N)
    tk = _pick_div_tile(K)
    grid = (M // tm, N // tn, K // tk)
    return pl.pallas_call(
        _linear_relu_kernel,
        out_shape=jax.ShapeDtypeStruct((M, N), out_dtype),
        grid=grid,
        in_specs=[pl.BlockSpec((tm, tk), lambda i, j, k: (i, k)),
                  pl.BlockSpec((tk, tn), lambda i, j, k: (k, j)),
                  pl.BlockSpec((1, tn), lambda i, j, k: (0, j))],
        out_specs=pl.BlockSpec((tm, tn), lambda i, j, k: (i, j)),
        scratch_shapes=[pltpu.VMEM((tm, tn), jnp.float32)],
        compiler_params=pltpu.CompilerParams(
            dimension_semantics=("parallel", "parallel", "arbitrary")),
    )(x_pad, w_pad, b_pad)


def _layerwise_forward(x_pad, prep, tb):
    """Used when padded weights exceed the per-core VMEM budget (e.g. large
    hidden sizes on v7x's 64 MiB/TC). Intermediates stay bf16."""
    h = x_pad
    n = len(prep["weights"])
    for li in range(n):
        out_dtype = jnp.float32 if li == n - 1 else jnp.bfloat16
        h = _linear_relu(h, prep["weights"][li], prep["biases"][li], out_dtype, tb)
    return h


# --------------------------------------------------------------------------- #
# Public forward
# --------------------------------------------------------------------------- #
def base_model_forward(x, prepared, force_layerwise=False):
    """BaseModel forward: 5x (Linear -> ReLU). x: (B, inp_shape) f32."""
    dims_pad = prepared["dims_pad"]
    d_out = prepared["dims"][-1]
    gen = prepared["gen"]
    B, d_in = x.shape

    tb = _pick_tb(B, gen)
    B_pad = _round_up(max(B, 1), tb)

    # bf16 input stream: half the HBM traffic of f32 (accumulation stays f32).
    x_pad = jnp.zeros((B_pad, dims_pad[0]), jnp.bfloat16)
    x_pad = x_pad.at[:B, :d_in].set(x.astype(jnp.bfloat16))

    w_bytes = sum(w.size * 2 for w in prepared["weights"]) + \
              sum(b.size * 4 for b in prepared["biases"])
    budget = int(0.85 * _vmem_capacity_bytes(gen))
    resident_need = (w_bytes
                     + 2 * tb * dims_pad[0] * 2
                     + 2 * tb * dims_pad[-1] * 4
                     + 2 * tb * max(dims_pad) * 4)

    if force_layerwise or resident_need > budget:
        out_pad = _layerwise_forward(x_pad, prepared, tb)
    else:
        try:
            out_pad = _fused_forward(x_pad, prepared, tb, use_buffered_weights=True)
        except Exception:
            # Older jax without BlockSpec pipeline_mode: default double buffering.
            out_pad = _fused_forward(x_pad, prepared, tb, use_buffered_weights=False)

    return out_pad[:B, :d_out]


# --------------------------------------------------------------------------- #
# Init / reference / self-test
# --------------------------------------------------------------------------- #
def init_params(key, inp_shape, output_shape):
    """Mimics torch.nn.Linear default init: U[-1/sqrt(fan_in), 1/sqrt(fan_in)].
    Weights stored as (in, out) == transpose of PyTorch's (out, in)."""
    dims = [
        (inp_shape, inp_shape * 2),
        (inp_shape * 2, inp_shape * 4),
        (inp_shape * 4, inp_shape * 4),
        (inp_shape * 4, inp_shape * 2),
        (inp_shape * 2, output_shape),
    ]
    params = []
    for fan_in, fan_out in dims:
        key, kw, kb = jax.random.split(key, 3)
        bound = 1.0 / (fan_in ** 0.5)
        w = jax.random.uniform(kw, (fan_in, fan_out), jnp.float32, -bound, bound)
        b = jax.random.uniform(kb, (1, fan_out), jnp.float32, -bound, bound)
        params.append((w, b))
    return params


def reference_forward(x, params):
    """Pure-JAX reference with the same numerics contract as the kernels
    (bf16 matmul operands, f32 accumulate, f32 bias-add + ReLU)."""
    h = x
    for w, b in params:
        y = jnp.dot(h.astype(jnp.bfloat16), w.astype(jnp.bfloat16),
                    preferred_element_type=jnp.float32)
        h = jnp.maximum(y + b, 0.0)
    return h


if __name__ == "__main__":
    key = jax.random.PRNGKey(0)
    inp_shape = 32
    output_shape = 16
    batch = 8

    kx, kp = jax.random.split(key)
    x = jax.random.normal(kx, (batch, inp_shape), jnp.float32)
    params = init_params(kp, inp_shape, output_shape)
    prepared = prepare_params(params)          # one-time pad + bf16 cast

    out = jax.block_until_ready(base_model_forward(x, prepared))
    ref = reference_forward(x, params)

    assert out.shape == (batch, output_shape), out.shape
    assert jnp.allclose(out, ref, atol=2e-3, rtol=2e-3), \
        float(jnp.max(jnp.abs(out - ref)))

    # Also exercise the weight-tiled fallback (used when padded weights exceed
    # the per-core VMEM budget, e.g. big hidden sizes on v7x).
    out_tiled = jax.block_until_ready(
        base_model_forward(x, prepared, force_layerwise=True))
    assert jnp.allclose(out_tiled, ref, atol=2e-3, rtol=2e-3), \
        float(jnp.max(jnp.abs(out_tiled - ref)))

    print("KERNEL_OK")
</pallas_src>

<mosaic_0001>
module attributes {stable_mosaic.version = 11 : i64} {
  func.func @_fused_mlp_kernel(%arg0: i32, %arg1: memref<16x128xbf16, #tpu.memory_space<vmem>>, %arg2: memref<128x128xbf16, #tpu.memory_space<vmem>>, %arg3: memref<1x128xf32, #tpu.memory_space<vmem>>, %arg4: memref<128x128xbf16, #tpu.memory_space<vmem>>, %arg5: memref<1x128xf32, #tpu.memory_space<vmem>>, %arg6: memref<128x128xbf16, #tpu.memory_space<vmem>>, %arg7: memref<1x128xf32, #tpu.memory_space<vmem>>, %arg8: memref<128x128xbf16, #tpu.memory_space<vmem>>, %arg9: memref<1x128xf32, #tpu.memory_space<vmem>>, %arg10: memref<128x128xbf16, #tpu.memory_space<vmem>>, %arg11: memref<1x128xf32, #tpu.memory_space<vmem>>, %arg12: memref<16x128xf32, #tpu.memory_space<vmem>>) attributes {dimension_semantics = [#tpu.dimension_semantics<parallel>], iteration_bounds = array<i64: 1>, scalar_prefetch = 0 : i64, scratch_operands = 0 : i64, tpu.core_type = #tpu.core_type<tc>, window_params = [{transform_indices = @transform_0, window_bounds = array<i64: 16, 128>}, {pipeline_mode = #tpu.pipeline_mode<synchronous>, transform_indices = @transform_1, window_bounds = array<i64: 128, 128>}, {pipeline_mode = #tpu.pipeline_mode<synchronous>, transform_indices = @transform_2, window_bounds = array<i64: 1, 128>}, {pipeline_mode = #tpu.pipeline_mode<synchronous>, transform_indices = @transform_3, window_bounds = array<i64: 128, 128>}, {pipeline_mode = #tpu.pipeline_mode<synchronous>, transform_indices = @transform_4, window_bounds = array<i64: 1, 128>}, {pipeline_mode = #tpu.pipeline_mode<synchronous>, transform_indices = @transform_5, window_bounds = array<i64: 128, 128>}, {pipeline_mode = #tpu.pipeline_mode<synchronous>, transform_indices = @transform_6, window_bounds = array<i64: 1, 128>}, {pipeline_mode = #tpu.pipeline_mode<synchronous>, transform_indices = @transform_7, window_bounds = array<i64: 128, 128>}, {pipeline_mode = #tpu.pipeline_mode<synchronous>, transform_indices = @transform_8, window_bounds = array<i64: 1, 128>}, {pipeline_mode = #tpu.pipeline_mode<synchronous>, transform_indices = @transform_9, window_bounds = array<i64: 128, 128>}, {pipeline_mode = #tpu.pipeline_mode<synchronous>, transform_indices = @transform_10, window_bounds = array<i64: 1, 128>}, {transform_indices = @transform_11, window_bounds = array<i64: 16, 128>}]} {
    %c0 = arith.constant 0 : index
    %c0_0 = arith.constant 0 : index
    %0 = vector.load %arg1[%c0, %c0_0] : memref<16x128xbf16, #tpu.memory_space<vmem>>, vector<16x128xbf16>
    %c0_1 = arith.constant 0 : index
    %c0_2 = arith.constant 0 : index
    %1 = vector.load %arg2[%c0_1, %c0_2] : memref<128x128xbf16, #tpu.memory_space<vmem>>, vector<128x128xbf16>
    %cst = arith.constant dense<0.000000e+00> : vector<16x128xf32>
    %2 = tpu.matmul %0, %1, %cst {dimension_numbers = #tpu.dot_dimension_numbers<[1], [0], [0], [1], [0, 0, 1, 1], [], []>} : vector<16x128xbf16>, vector<128x128xbf16>, vector<16x128xf32> -> vector<16x128xf32>
    %c0_3 = arith.constant 0 : index
    %c0_4 = arith.constant 0 : index
    %3 = vector.load %arg3[%c0_3, %c0_4] : memref<1x128xf32, #tpu.memory_space<vmem>>, vector<1x128xf32>
    %4 = vector.broadcast %3 : vector<1x128xf32> to vector<16x128xf32>
    %5 = arith.addf %2, %4 : vector<16x128xf32>
    %cst_5 = arith.constant 0.000000e+00 : f32
    %6 = vector.broadcast %cst_5 : f32 to vector<16x128xf32>
    %7 = arith.maximumf %5, %6 : vector<16x128xf32>
    %8 = arith.truncf %7 : vector<16x128xf32> to vector<16x128xbf16>
    %c0_6 = arith.constant 0 : index
    %c0_7 = arith.constant 0 : index
    %9 = vector.load %arg4[%c0_6, %c0_7] : memref<128x128xbf16, #tpu.memory_space<vmem>>, vector<128x128xbf16>
    %cst_8 = arith.constant dense<0.000000e+00> : vector<16x128xf32>
    %10 = tpu.matmul %8, %9, %cst_8 {dimension_numbers = #tpu.dot_dimension_numbers<[1], [0], [0], [1], [0, 0, 1, 1], [], []>} : vector<16x128xbf16>, vector<128x128xbf16>, vector<16x128xf32> -> vector<16x128xf32>
    %c0_9 = arith.constant 0 : index
    %c0_10 = arith.constant 0 : index
    %11 = vector.load %arg5[%c0_9, %c0_10] : memref<1x128xf32, #tpu.memory_space<vmem>>, vector<1x128xf32>
    %12 = vector.broadcast %11 : vector<1x128xf32> to vector<16x128xf32>
    %13 = arith.addf %10, %12 : vector<16x128xf32>
    %cst_11 = arith.constant 0.000000e+00 : f32
    %14 = vector.broadcast %cst_11 : f32 to vector<16x128xf32>
    %15 = arith.maximumf %13, %14 : vector<16x128xf32>
    %16 = arith.truncf %15 : vector<16x128xf32> to vector<16x128xbf16>
    %c0_12 = arith.constant 0 : index
    %c0_13 = arith.constant 0 : index
    %17 = vector.load %arg6[%c0_12, %c0_13] : memref<128x128xbf16, #tpu.memory_space<vmem>>, vector<128x128xbf16>
    %cst_14 = arith.constant dense<0.000000e+00> : vector<16x128xf32>
    %18 = tpu.matmul %16, %17, %cst_14 {dimension_numbers = #tpu.dot_dimension_numbers<[1], [0], [0], [1], [0, 0, 1, 1], [], []>} : vector<16x128xbf16>, vector<128x128xbf16>, vector<16x128xf32> -> vector<16x128xf32>
    %c0_15 = arith.constant 0 : index
    %c0_16 = arith.constant 0 : index
    %19 = vector.load %arg7[%c0_15, %c0_16] : memref<1x128xf32, #tpu.memory_space<vmem>>, vector<1x128xf32>
    %20 = vector.broadcast %19 : vector<1x128xf32> to vector<16x128xf32>
    %21 = arith.addf %18, %20 : vector<16x128xf32>
    %cst_17 = arith.constant 0.000000e+00 : f32
    %22 = vector.broadcast %cst_17 : f32 to vector<16x128xf32>
    %23 = arith.maximumf %21, %22 : vector<16x128xf32>
    %24 = arith.truncf %23 : vector<16x128xf32> to vector<16x128xbf16>
    %c0_18 = arith.constant 0 : index
    %c0_19 = arith.constant 0 : index
    %25 = vector.load %arg8[%c0_18, %c0_19] : memref<128x128xbf16, #tpu.memory_space<vmem>>, vector<128x128xbf16>
    %cst_20 = arith.constant dense<0.000000e+00> : vector<16x128xf32>
    %26 = tpu.matmul %24, %25, %cst_20 {dimension_numbers = #tpu.dot_dimension_numbers<[1], [0], [0], [1], [0, 0, 1, 1], [], []>} : vector<16x128xbf16>, vector<128x128xbf16>, vector<16x128xf32> -> vector<16x128xf32>
    %c0_21 = arith.constant 0 : index
    %c0_22 = arith.constant 0 : index
    %27 = vector.load %arg9[%c0_21, %c0_22] : memref<1x128xf32, #tpu.memory_space<vmem>>, vector<1x128xf32>
    %28 = vector.broadcast %27 : vector<1x128xf32> to vector<16x128xf32>
    %29 = arith.addf %26, %28 : vector<16x128xf32>
    %cst_23 = arith.constant 0.000000e+00 : f32
    %30 = vector.broadcast %cst_23 : f32 to vector<16x128xf32>
    %31 = arith.maximumf %29, %30 : vector<16x128xf32>
    %32 = arith.truncf %31 : vector<16x128xf32> to vector<16x128xbf16>
    %c0_24 = arith.constant 0 : index
    %c0_25 = arith.constant 0 : index
    %33 = vector.load %arg10[%c0_24, %c0_25] : memref<128x128xbf16, #tpu.memory_space<vmem>>, vector<128x128xbf16>
    %cst_26 = arith.constant dense<0.000000e+00> : vector<16x128xf32>
    %34 = tpu.matmul %32, %33, %cst_26 {dimension_numbers = #tpu.dot_dimension_numbers<[1], [0], [0], [1], [0, 0, 1, 1], [], []>} : vector<16x128xbf16>, vector<128x128xbf16>, vector<16x128xf32> -> vector<16x128xf32>
    %c0_27 = arith.constant 0 : index
    %c0_28 = arith.constant 0 : index
    %35 = vector.load %arg11[%c0_27, %c0_28] : memref<1x128xf32, #tpu.memory_space<vmem>>, vector<1x128xf32>
    %36 = vector.broadcast %35 : vector<1x128xf32> to vector<16x128xf32>
    %37 = arith.addf %34, %36 : vector<16x128xf32>
    %cst_29 = arith.constant 0.000000e+00 : f32
    %38 = vector.broadcast %cst_29 : f32 to vector<16x128xf32>
    %39 = arith.maximumf %37, %38 : vector<16x128xf32>
    %c0_30 = arith.constant 0 : index
    %c0_31 = arith.constant 0 : index
    %40 = vector.load %arg12[%c0_30, %c0_31] : memref<16x128xf32, #tpu.memory_space<vmem>>, vector<16x128xf32>
    tpu.vector_store %arg12[%c0_30, %c0_31], %39 {strides = array<i32>} : memref<16x128xf32, #tpu.memory_space<vmem>>, vector<16x128xf32>,
    return
  }
  func.func @transform_0(%arg0: i32) -> (i32, i32) {
    %c0_i32 = arith.constant 0 : i32
    %c0_i32_0 = arith.constant 0 : i32
    return %arg0, %c0_i32 : i32, i32
  }
  func.func @transform_1(%arg0: i32) -> (i32, i32) {
    %c0_i32 = arith.constant 0 : i32
    %c0_i32_0 = arith.constant 0 : i32
    %c0_i32_1 = arith.constant 0 : i32
    return %c0_i32, %c0_i32_0 : i32, i32
  }
  func.func @transform_2(%arg0: i32) -> (i32, i32) {
    %c0_i32 = arith.constant 0 : i32
    %c0_i32_0 = arith.constant 0 : i32
    %c0_i32_1 = arith.constant 0 : i32
    return %c0_i32, %c0_i32_0 : i32, i32
  }
  func.func @transform_3(%arg0: i32) -> (i32, i32) {
    %c0_i32 = arith.constant 0 : i32
    %c0_i32_0 = arith.constant 0 : i32
    %c0_i32_1 = arith.constant 0 : i32
    return %c0_i32, %c0_i32_0 : i32, i32
  }
  func.func @transform_4(%arg0: i32) -> (i32, i32) {
    %c0_i32 = arith.constant 0 : i32
    %c0_i32_0 = arith.constant 0 : i32
    %c0_i32_1 = arith.constant 0 : i32
    return %c0_i32, %c0_i32_0 : i32, i32
  }
  func.func @transform_5(%arg0: i32) -> (i32, i32) {
    %c0_i32 = arith.constant 0 : i32
    %c0_i32_0 = arith.constant 0 : i32
    %c0_i32_1 = arith.constant 0 : i32
    return %c0_i32, %c0_i32_0 : i32, i32
  }
  func.func @transform_6(%arg0: i32) -> (i32, i32) {
    %c0_i32 = arith.constant 0 : i32
    %c0_i32_0 = arith.constant 0 : i32
    %c0_i32_1 = arith.constant 0 : i32
    return %c0_i32, %c0_i32_0 : i32, i32
  }
  func.func @transform_7(%arg0: i32) -> (i32, i32) {
    %c0_i32 = arith.constant 0 : i32
    %c0_i32_0 = arith.constant 0 : i32
    %c0_i32_1 = arith.constant 0 : i32
    return %c0_i32, %c0_i32_0 : i32, i32
  }
  func.func @transform_8(%arg0: i32) -> (i32, i32) {
    %c0_i32 = arith.constant 0 : i32
    %c0_i32_0 = arith.constant 0 : i32
    %c0_i32_1 = arith.constant 0 : i32
    return %c0_i32, %c0_i32_0 : i32, i32
  }
  func.func @transform_9(%arg0: i32) -> (i32, i32) {
    %c0_i32 = arith.constant 0 : i32
    %c0_i32_0 = arith.constant 0 : i32
    %c0_i32_1 = arith.constant 0 : i32
    return %c0_i32, %c0_i32_0 : i32, i32
  }
  func.func @transform_10(%arg0: i32) -> (i32, i32) {
    %c0_i32 = arith.constant 0 : i32
    %c0_i32_0 = arith.constant 0 : i32
    %c0_i32_1 = arith.constant 0 : i32
    return %c0_i32, %c0_i32_0 : i32, i32
  }
  func.func @transform_11(%arg0: i32) -> (i32, i32) {
    %c0_i32 = arith.constant 0 : i32
    %c0_i32_0 = arith.constant 0 : i32
    return %arg0, %c0_i32 : i32, i32
  }
}

module attributes {stable_mosaic.version = 11 : i64} {
  func.func @_fused_mlp_kernel(%arg0: i32, %arg1: memref<16x128xbf16, #tpu.memory_space<vmem>>, %arg2: memref<128x128xbf16, #tpu.memory_space<vmem>>, %arg3: memref<1x128xf32, #tpu.memory_space<vmem>>, %arg4: memref<128x128xbf16, #tpu.memory_space<vmem>>, %arg5: memref<1x128xf32, #tpu.memory_space<vmem>>, %arg6: memref<128x128xbf16, #tpu.memory_space<vmem>>, %arg7: memref<1x128xf32, #tpu.memory_space<vmem>>, %arg8: memref<128x128xbf16, #tpu.memory_space<vmem>>, %arg9: memref<1x128xf32, #tpu.memory_space<vmem>>, %arg10: memref<128x128xbf16, #tpu.memory_space<vmem>>, %arg11: memref<1x128xf32, #tpu.memory_space<vmem>>, %arg12: memref<16x128xf32, #tpu.memory_space<vmem>>) attributes {dimension_semantics = [#tpu.dimension_semantics<parallel>], iteration_bounds = array<i64: 1>, scalar_prefetch = 0 : i64, scratch_operands = 0 : i64, tpu.core_type = #tpu.core_type<tc>, window_params = [{transform_indices = @transform_0, window_bounds = array<i64: 16, 128>}, {pipeline_mode = #tpu.pipeline_mode<synchronous>, transform_indices = @transform_1, window_bounds = array<i64: 128, 128>}, {pipeline_mode = #tpu.pipeline_mode<synchronous>, transform_indices = @transform_2, window_bounds = array<i64: 1, 128>}, {pipeline_mode = #tpu.pipeline_mode<synchronous>, transform_indices = @transform_3, window_bounds = array<i64: 128, 128>}, {pipeline_mode = #tpu.pipeline_mode<synchronous>, transform_indices = @transform_4, window_bounds = array<i64: 1, 128>}, {pipeline_mode = #tpu.pipeline_mode<synchronous>, transform_indices = @transform_5, window_bounds = array<i64: 128, 128>}, {pipeline_mode = #tpu.pipeline_mode<synchronous>, transform_indices = @transform_6, window_bounds = array<i64: 1, 128>}, {pipeline_mode = #tpu.pipeline_mode<synchronous>, transform_indices = @transform_7, window_bounds = array<i64: 128, 128>}, {pipeline_mode = #tpu.pipeline_mode<synchronous>, transform_indices = @transform_8, window_bounds = array<i64: 1, 128>}, {pipeline_mode = #tpu.pipeline_mode<synchronous>, transform_indices = @transform_9, window_bounds = array<i64: 128, 128>}, {pipeline_mode = #tpu.pipeline_mode<synchronous>, transform_indices = @transform_10, window_bounds = array<i64: 1, 128>}, {transform_indices = @transform_11, window_bounds = array<i64: 16, 128>}]} {
    %c0 = arith.constant 0 : index
    %c0_0 = arith.constant 0 : index
    %0 = vector.load %arg1[%c0, %c0_0] : memref<16x128xbf16, #tpu.memory_space<vmem>>, vector<16x128xbf16>
    %c0_1 = arith.constant 0 : index
    %c0_2 = arith.constant 0 : index
    %1 = vector.load %arg2[%c0_1, %c0_2] : memref<128x128xbf16, #tpu.memory_space<vmem>>, vector<128x128xbf16>
    %cst = arith.constant dense<0.000000e+00> : vector<16x128xf32>
    %2 = tpu.matmul %0, %1, %cst {dimension_numbers = #tpu.dot_dimension_numbers<[1], [0], [0], [1], [0, 0, 1, 1], [], []>} : vector<16x128xbf16>, vector<128x128xbf16>, vector<16x128xf32> -> vector<16x128xf32>
    %c0_3 = arith.constant 0 : index
    %c0_4 = arith.constant 0 : index
    %3 = vector.load %arg3[%c0_3, %c0_4] : memref<1x128xf32, #tpu.memory_space<vmem>>, vector<1x128xf32>
    %4 = vector.broadcast %3 : vector<1x128xf32> to vector<16x128xf32>
    %5 = arith.addf %2, %4 : vector<16x128xf32>
    %cst_5 = arith.constant 0.000000e+00 : f32
    %6 = vector.broadcast %cst_5 : f32 to vector<16x128xf32>
    %7 = arith.maximumf %5, %6 : vector<16x128xf32>
    %8 = arith.truncf %7 : vector<16x128xf32> to vector<16x128xbf16>
    %c0_6 = arith.constant 0 : index
    %c0_7 = arith.constant 0 : index
    %9 = vector.load %arg4[%c0_6, %c0_7] : memref<128x128xbf16, #tpu.memory_space<vmem>>, vector<128x128xbf16>
    %cst_8 = arith.constant dense<0.000000e+00> : vector<16x128xf32>
    %10 = tpu.matmul %8, %9, %cst_8 {dimension_numbers = #tpu.dot_dimension_numbers<[1], [0], [0], [1], [0, 0, 1, 1], [], []>} : vector<16x128xbf16>, vector<128x128xbf16>, vector<16x128xf32> -> vector<16x128xf32>
    %c0_9 = arith.constant 0 : index
    %c0_10 = arith.constant 0 : index
    %11 = vector.load %arg5[%c0_9, %c0_10] : memref<1x128xf32, #tpu.memory_space<vmem>>, vector<1x128xf32>
    %12 = vector.broadcast %11 : vector<1x128xf32> to vector<16x128xf32>
    %13 = arith.addf %10, %12 : vector<16x128xf32>
    %cst_11 = arith.constant 0.000000e+00 : f32
    %14 = vector.broadcast %cst_11 : f32 to vector<16x128xf32>
    %15 = arith.maximumf %13, %14 : vector<16x128xf32>
    %16 = arith.truncf %15 : vector<16x128xf32> to vector<16x128xbf16>
    %c0_12 = arith.constant 0 : index
    %c0_13 = arith.constant 0 : index
    %17 = vector.load %arg6[%c0_12, %c0_13] : memref<128x128xbf16, #tpu.memory_space<vmem>>, vector<128x128xbf16>
    %cst_14 = arith.constant dense<0.000000e+00> : vector<16x128xf32>
    %18 = tpu.matmul %16, %17, %cst_14 {dimension_numbers = #tpu.dot_dimension_numbers<[1], [0], [0], [1], [0, 0, 1, 1], [], []>} : vector<16x128xbf16>, vector<128x128xbf16>, vector<16x128xf32> -> vector<16x128xf32>
    %c0_15 = arith.constant 0 : index
    %c0_16 = arith.constant 0 : index
    %19 = vector.load %arg7[%c0_15, %c0_16] : memref<1x128xf32, #tpu.memory_space<vmem>>, vector<1x128xf32>
    %20 = vector.broadcast %19 : vector<1x128xf32> to vector<16x128xf32>
    %21 = arith.addf %18, %20 : vector<16x128xf32>
    %cst_17 = arith.constant 0.000000e+00 : f32
    %22 = vector.broadcast %cst_17 : f32 to vector<16x128xf32>
    %23 = arith.maximumf %21, %22 : vector<16x128xf32>
    %24 = arith.truncf %23 : vector<16x128xf32> to vector<16x128xbf16>
    %c0_18 = arith.constant 0 : index
    %c0_19 = arith.constant 0 : index
    %25 = vector.load %arg8[%c0_18, %c0_19] : memref<128x128xbf16, #tpu.memory_space<vmem>>, vector<128x128xbf16>
    %cst_20 = arith.constant dense<0.000000e+00> : vector<16x128xf32>
    %26 = tpu.matmul %24, %25, %cst_20 {dimension_numbers = #tpu.dot_dimension_numbers<[1], [0], [0], [1], [0, 0, 1, 1], [], []>} : vector<16x128xbf16>, vector<128x128xbf16>, vector<16x128xf32> -> vector<16x128xf32>
    %c0_21 = arith.constant 0 : index
    %c0_22 = arith.constant 0 : index
    %27 = vector.load %arg9[%c0_21, %c0_22] : memref<1x128xf32, #tpu.memory_space<vmem>>, vector<1x128xf32>
    %28 = vector.broadcast %27 : vector<1x128xf32> to vector<16x128xf32>
    %29 = arith.addf %26, %28 : vector<16x128xf32>
    %cst_23 = arith.constant 0.000000e+00 : f32
    %30 = vector.broadcast %cst_23 : f32 to vector<16x128xf32>
    %31 = arith.maximumf %29, %30 : vector<16x128xf32>
    %32 = arith.truncf %31 : vector<16x128xf32> to vector<16x128xbf16>
    %c0_24 = arith.constant 0 : index
    %c0_25 = arith.constant 0 : index
    %33 = vector.load %arg10[%c0_24, %c0_25] : memref<128x128xbf16, #tpu.memory_space<vmem>>, vector<128x128xbf16>
    %cst_26 = arith.constant dense<0.000000e+00> : vector<16x128xf32>
    %34 = tpu.matmul %32, %33, %cst_26 {dimension_numbers = #tpu.dot_dimension_numbers<[1], [0], [0], [1], [0, 0, 1, 1], [], []>} : vector<16x128xbf16>, vector<128x128xbf16>, vector<16x128xf32> -> vector<16x128xf32>
    %c0_27 = arith.constant 0 : index
    %c0_28 = arith.constant 0 : index
    %35 = vector.load %arg11[%c0_27, %c0_28] : memref<1x128xf32, #tpu.memory_space<vmem>>, vector<1x128xf32>
    %36 = vector.broadcast %35 : vector<1x128xf32> to vector<16x128xf32>
    %37 = arith.addf %34, %36 : vector<16x128xf32>
    %cst_29 = arith.constant 0.000000e+00 : f32
    %38 = vector.broadcast %cst_29 : f32 to vector<16x128xf32>
    %39 = arith.maximumf %37, %38 : vector<16x128xf32>
    %c0_30 = arith.constant 0 : index
    %c0_31 = arith.constant 0 : index
    %40 = vector.load %arg12[%c0_30, %c0_31] : memref<16x128xf32, #tpu.memory_space<vmem>>, vector<16x128xf32>
    tpu.vector_store %arg12[%c0_30, %c0_31], %39 {strides = array<i32>} : memref<16x128xf32, #tpu.memory_space<vmem>>, vector<16x128xf32>,
    return
  }
  func.func @transform_0(%arg0: i32) -> (i32, i32) {
    %c0_i32 = arith.constant 0 : i32
    %c0_i32_0 = arith.constant 0 : i32
    return %arg0, %c0_i32 : i32, i32
  }
  func.func @transform_1(%arg0: i32) -> (i32, i32) {
    %c0_i32 = arith.constant 0 : i32
    %c0_i32_0 = arith.constant 0 : i32
    %c0_i32_1 = arith.constant 0 : i32
    return %c0_i32, %c0_i32_0 : i32, i32
  }
  func.func @transform_2(%arg0: i32) -> (i32, i32) {
    %c0_i32 = arith.constant 0 : i32
    %c0_i32_0 = arith.constant 0 : i32
    %c0_i32_1 = arith.constant 0 : i32
    return %c0_i32, %c0_i32_0 : i32, i32
  }
  func.func @transform_3(%arg0: i32) -> (i32, i32) {
    %c0_i32 = arith.constant 0 : i32
    %c0_i32_0 = arith.constant 0 : i32
    %c0_i32_1 = arith.constant 0 : i32
    return %c0_i32, %c0_i32_0 : i32, i32
  }
  func.func @transform_4(%arg0: i32) -> (i32, i32) {
    %c0_i32 = arith.constant 0 : i32
    %c0_i32_0 = arith.constant 0 : i32
    %c0_i32_1 = arith.constant 0 : i32
    return %c0_i32, %c0_i32_0 : i32, i32
  }
  func.func @transform_5(%arg0: i32) -> (i32, i32) {
    %c0_i32 = arith.constant 0 : i32
    %c0_i32_0 = arith.constant 0 : i32
    %c0_i32_1 = arith.constant 0 : i32
    return %c0_i32, %c0_i32_0 : i32, i32
  }
  func.func @transform_6(%arg0: i32) -> (i32, i32) {
    %c0_i32 = arith.constant 0 : i32
    %c0_i32_0 = arith.constant 0 : i32
    %c0_i32_1 = arith.constant 0 : i32
    return %c0_i32, %c0_i32_0 : i32, i32
  }
  func.func @transform_7(%arg0: i32) -> (i32, i32) {
    %c0_i32 = arith.constant 0 : i32
    %c0_i32_0 = arith.constant 0 : i32
    %c0_i32_1 = arith.constant 0 : i32
    return %c0_i32, %c0_i32_0 : i32, i32
  }
  func.func @transform_8(%arg0: i32) -> (i32, i32) {
    %c0_i32 = arith.constant 0 : i32
    %c0_i32_0 = arith.constant 0 : i32
    %c0_i32_1 = arith.constant 0 : i32
    return %c0_i32, %c0_i32_0 : i32, i32
  }
  func.func @transform_9(%arg0: i32) -> (i32, i32) {
    %c0_i32 = arith.constant 0 : i32
    %c0_i32_0 = arith.constant 0 : i32
    %c0_i32_1 = arith.constant 0 : i32
    return %c0_i32, %c0_i32_0 : i32, i32
  }
  func.func @transform_10(%arg0: i32) -> (i32, i32) {
    %c0_i32 = arith.constant 0 : i32
    %c0_i32_0 = arith.constant 0 : i32
    %c0_i32_1 = arith.constant 0 : i32
    return %c0_i32, %c0_i32_0 : i32, i32
  }
  func.func @transform_11(%arg0: i32) -> (i32, i32) {
    %c0_i32 = arith.constant 0 : i32
    %c0_i32_0 = arith.constant 0 : i32
    return %arg0, %c0_i32 : i32, i32
  }
}

</mosaic_0001>

<bundles_post_ra>
// kernel: tpu_custom_call.1
= control target key start
LH: loop header
LB: loop body
LE: loop exit
PB: predicated region body
PF: predicated region fallthrough
CT: control target
= control target key end

     0   :  { %16 = vsyncpa [#allocation3], 0  ;;  %s1298_s0 = inlined_call_operand.hbm [shape: bf16[16,128], index: 0, kind: input, shape index: {}]   ;;  %s1299_s1 = inlined_call_operand.hbm [shape: bf16[128,128], index: 1, kind: input, shape index: {}]   ;;  %s1300_s2 = inlined_call_operand.vmem [shape: f32[1,128], index: 2, kind: input, shape index: {}]   ;;  %s1301_s3 = inlined_call_operand.hbm [shape: bf16[128,128], index: 3, kind: input, shape index: {}]   ;;  %s1302_s4 = inlined_call_operand.vmem [shape: f32[1,128], index: 4, kind: input, shape index: {}]   ;;  %s1303_s5 = inlined_call_operand.hbm [shape: bf16[128,128], index: 5, kind: input, shape index: {}]   ;;  %s1304_s6 = inlined_call_operand.vmem [shape: f32[1,128], index: 6, kind: input, shape index: {}]   ;;  %s1305_s7 = inlined_call_operand.hbm [shape: bf16[128,128], index: 7, kind: input, shape index: {}]   ;;  %s1306_s8 = inlined_call_operand.vmem [shape: f32[1,128], index: 8, kind: input, shape index: {}]   ;;  %s1307_s9 = inlined_call_operand.hbm [shape: bf16[128,128], index: 9, kind: input, shape index: {}]   ;;  %s1308_s10 = inlined_call_operand.vmem [shape: f32[1,128], index: 10, kind: input, shape index: {}]   ;;  %s1309_s11 = inlined_call_operand.hbm [shape: f32[16,128], index: 11, kind: output, shape index: {}]  }
   0x1   :  { %17 = vsyncpa [#allocation6], 0 }
   0x2   :  { %18 = vsyncpa [#allocation9], 0 }
   0x3   :  { %19 = vsyncpa [#allocation12], 0 }
   0x4   :  { %20 = vsyncpa [#allocation4], 0  ;;  %s1121_s17 = smov [#allocation5]   ;;  %s1122_s19 = smov [#allocation8]  }
   0x5   :  { %s38_s18 = sshll.u32 %s1121_s17, 4  ;;  %s66_s20 = sshll.u32 %s1122_s19, 4  ;;  %s39_s18 = int_to_ptr.vmem [resolvable:$true] %s38_s18  ;;  %s67_s20 = int_to_ptr.vmem [resolvable:$true] %s66_s20 }
   0x6   :  { %s979_s21 = scalar_lea.vmem %s39_s18, 1024  ;;  %p984_p1 = scmp.lt.s32.totalorder %s39_s18, %s39_s18 }
   0x7   :  { %p980_p0 = scmp.ne.s32.totalorder %s39_s18, %s979_s21  ;;  %p985_p2 = scmp.lt.s32.totalorder %s979_s21, %s979_s21 }
   0x9   :  { %p986_p3 = por %p985_p2, %p984_p1 }
   0xb   :  { %p987_p4 = pnand %p986_p3, %p980_p0 }
   0xd   :  { %990 = shalt.err (!%p987_p4)
}
   0xe   :  { %s1123_s22 = smov 64   ;;  %s1124_s23 = smov 4  }
   0xf   :  { %44 = dma.hbm_to_vmem [thread:$0]  %s1299_s1, 1024, %s39_s18, [#allocation6], %s1123_s22, %s1123_s22, %s1124_s23  }
  0x10   :  { %s999_s26 = scalar_lea.vmem %s67_s20, 1024  ;;  %p1004_p6 = scmp.lt.s32.totalorder %s67_s20, %s67_s20 }
  0x11   :  { %p1000_p5 = scmp.ne.s32.totalorder %s67_s20, %s999_s26  ;;  %p1005_p7 = scmp.lt.s32.totalorder %s999_s26, %s999_s26 }
  0x13   :  { %p1006_p8 = por %p1005_p7, %p1004_p6 }
  0x15   :  { %p1007_p9 = pnand %p1006_p8, %p1000_p5 }
  0x17   :  { %1010 = shalt.err (!%p1007_p9)
}
  0x18   :  { %72 = dma.hbm_to_vmem [thread:$0]  %s1303_s5, 1024, %s67_s20, [#allocation9], %s1123_s22, %s1123_s22, %s1124_s23  }
  0x19   :  { %s1125_s29 = smov [#allocation2]   ;;  %s1126_s12 = smov [#allocation7]  }
  0x1a   :  { %s26_s30 = sshll.u32 %s1125_s29, 4  ;;  %s52_s13 = sshll.u32 %s1126_s12, 4  ;;  %s27_s30 = int_to_ptr.vmem [resolvable:$true] %s26_s30  ;;  %s53_s13 = int_to_ptr.vmem [resolvable:$true] %s52_s13 }
  0x1b   :  { %s1019_s1 = scalar_lea.vmem %s27_s30, 128  ;;  %p1024_p11 = scmp.lt.s32.totalorder %s27_s30, %s27_s30 }
  0x1c   :  { %p1020_p10 = scmp.ne.s32.totalorder %s27_s30, %s1019_s1  ;;  %p1025_p12 = scmp.lt.s32.totalorder %s1019_s1, %s1019_s1 }
  0x1e   :  { %p1026_p13 = por %p1025_p12, %p1024_p11 }
  0x20   :  { %p1027_p0 = pnand %p1026_p13, %p1020_p10 }
  0x22   :  { %1030 = shalt.err (!%p1027_p0)
}
  0x23   :  { %32 = dma.hbm_to_vmem [thread:$0]  %s1298_s0, 128, %s27_s30, [#allocation3], %s1123_s22, %s1123_s22, %s1124_s23  }
  0x24   :  { %s1039_s5 = scalar_lea.vmem %s53_s13, 1024  ;;  %p1044_p2 = scmp.lt.s32.totalorder %s53_s13, %s53_s13 }
  0x25   :  { %p1040_p1 = scmp.ne.s32.totalorder %s53_s13, %s1039_s5  ;;  %p1045_p3 = scmp.lt.s32.totalorder %s1039_s5, %s1039_s5 }
  0x27   :  { %p1046_p4 = por %p1045_p3, %p1044_p2 }
  0x29   :  { %p1047_p5 = pnand %p1046_p4, %p1040_p1 }
  0x2b   :  { %1050 = shalt.err (!%p1047_p5)
}
  0x2c   :  { %58 = dma.hbm_to_vmem [thread:$0]  %s1301_s3, 1024, %s53_s13, [#allocation6], %s1123_s22, %s1123_s22, %s1124_s23  }
  0x2d   :  { %s1127_s18 = smov [#allocation10]   ;;  %s1128_s20 = smov [#allocation11]  }
  0x2e   :  { %s80_s19 = sshll.u32 %s1127_s18, 4  ;;  %s94_s21 = sshll.u32 %s1128_s20, 4  ;;  %s81_s19 = int_to_ptr.vmem [resolvable:$true] %s80_s19  ;;  %s95_s21 = int_to_ptr.vmem [resolvable:$true] %s94_s21 }
  0x2f   :  { %s1059_s0 = scalar_lea.vmem %s81_s19, 1024  ;;  %p1064_p7 = scmp.lt.s32.totalorder %s81_s19, %s81_s19 }
  0x30   :  { %p1060_p6 = scmp.ne.s32.totalorder %s81_s19, %s1059_s0  ;;  %p1065_p8 = scmp.lt.s32.totalorder %s1059_s0, %s1059_s0 }
  0x32   :  { %p1066_p9 = por %p1065_p8, %p1064_p7 }
  0x34   :  { %p1067_p10 = pnand %p1066_p9, %p1060_p6 }
  0x36   :  { %1070 = shalt.err (!%p1067_p10)
}
  0x37   :  { %86 = dma.hbm_to_vmem [thread:$0]  %s1305_s7, 1024, %s81_s19, [#allocation9], %s1123_s22, %s1123_s22, %s1124_s23  }
  0x38   :  { %s1079_s3 = scalar_lea.vmem %s95_s21, 1024  ;;  %p1084_p12 = scmp.lt.s32.totalorder %s95_s21, %s95_s21 }
  0x39   :  { %p1080_p11 = scmp.ne.s32.totalorder %s95_s21, %s1079_s3  ;;  %p1085_p13 = scmp.lt.s32.totalorder %s1079_s3, %s1079_s3 }
  0x3b   :  { %p1086_p0 = por %p1085_p13, %p1084_p12 }
  0x3d   :  { %p1087_p1 = pnand %p1086_p0, %p1080_p11 }
  0x3f   :  { %1090 = shalt.err (!%p1087_p1)
}
  0x40   :  { %100 = dma.hbm_to_vmem [thread:$0]  %s1307_s9, 1024, %s95_s21, [#allocation12], %s1123_s22, %s1123_s22, %s1124_s23  }
  0x41   :  { %1111 = dma.done.wait [#allocation3], 128  }
  0x42   :  { %1112 = vsyncadd [#allocation3], 4294967168 }
  0x43   :  { %1113 = dma.done.wait [#allocation6], 2048  }
  0x44   :  { %1114 = vsyncadd [#allocation6], 4294965248 }
  0x45   :  { %1115 = dma.done.wait [#allocation9], 2048  }
  0x46   :  { %1116 = vsyncadd [#allocation9], 4294965248 }
  0x47   :  { %1117 = dma.done.wait [#allocation12], 1024  }
  0x48   :  { %1118 = vsyncadd [#allocation12], 4294966272  ;;  %v1129_v0 = vmov 0.0   ;;  %vm1130_vm0 = vmmov 0   ;;  %v930_v1 = vld [vmem:[#allocation5 + $0x38] sm:$0xff]   ;;  %v931_v2 = vld [vmem:[#allocation5 + $0x30] sm:$0xff]  }
  0x49   :  { %817 = vmatprep.subr.bf16.mxu0 %v1129_v0  ;;  %833 = vmatprep.mubr.msk.bf16.mxu0 %vm1130_vm0, %v1129_v0  ;;  %v932_v3 = vld [vmem:[#allocation5 + $0x28] sm:$0xff]   ;;  %v939_v4 = vld [vmem:[#allocation7 + $0x38] sm:$0xff]   ;;  %v933_v5 = vld [vmem:[#allocation5 + $0x20] sm:$0xff]   ;;  %s1131_s12 = smov [#allocation13]  }
  0x4a   :  { %837 = vmatprep.subr.bf16.mxu1 %v1129_v0  ;;  %853 = vmatprep.mubr.msk.bf16.mxu1 %vm1130_vm0, %v1129_v0  ;;  %v940_v6 = vld [vmem:[#allocation7 + $0x30] sm:$0xff]   ;;  %v934_v7 = vld [vmem:[#allocation5 + $0x18] sm:$0xff]   ;;  %v941_v8 = vld [vmem:[#allocation7 + $0x28] sm:$0xff]  }
  0x4b   :  { %818 = vmatpush3.bf16.msra.mxu0 %v930_v1  ;;  %838 = vmatpush3.bf16.msra.mxu1 %v939_v4  ;;  %v935_v9 = vld [vmem:[#allocation5 + $0x10] sm:$0xff]   ;;  %v942_v10 = vld [vmem:[#allocation7 + $0x20] sm:$0xff]   ;;  %v936_v11 = vld [vmem:[#allocation5 + $0x8] sm:$0xff]  }
  0x4c   :  { %819 = vmatprep.subr.bf16.mxu0 %v1129_v0  ;;  %839 = vmatprep.subr.bf16.mxu1 %v1129_v0  ;;  %v943_v12 = vld [vmem:[#allocation7 + $0x18] sm:$0xff]   ;;  %v937_v13 = vld [vmem:[#allocation5] sm:$0xff]   ;;  %v944_v15 = vld [vmem:[#allocation7 + $0x10] sm:$0xff]  }
  0x4d   :  { %v938_v14 = vld [vmem:[#allocation2] sm:$0xff]   ;;  %v945_v16 = vld [vmem:[#allocation7 + $0x8] sm:$0xff]   ;;  %v946_v17 = vld [vmem:[#allocation7] sm:$0xff]  }
  0x4e   :  { %v947_v18 = vld [vmem:[#allocation8 + $0x38] sm:$0xff]   ;;  %v948_v19 = vld [vmem:[#allocation8 + $0x30] sm:$0xff]   ;;  %v949_v20 = vld [vmem:[#allocation8 + $0x28] sm:$0xff]  }
  0x4f   :  { %820 = vmatpush3.bf16.msra.mxu0 %v931_v2  ;;  %840 = vmatpush3.bf16.msra.mxu1 %v940_v6  ;;  %v950_v21 = vld [vmem:[#allocation8 + $0x20] sm:$0xff]   ;;  %v951_v22 = vld [vmem:[#allocation8 + $0x18] sm:$0xff]   ;;  %v952_v33 = vld [vmem:[#allocation8 + $0x10] sm:$0xff]  }
  0x50   :  { %821 = vmatprep.subr.bf16.mxu0 %v1129_v0  ;;  %841 = vmatprep.subr.bf16.mxu1 %v1129_v0  ;;  %v726_v23 = vld [vmem:[%s1300_s2] ss:$0 sm:$0xff]  ;;  %v953_v34 = vld [vmem:[#allocation8 + $0x8] sm:$0xff]   ;;  %v954_v35 = vld [vmem:[#allocation8] sm:$0xff]  }
  0x51   :  { %v955_v36 = vld [vmem:[#allocation10 + $0x38] sm:$0xff]   ;;  %v956_v37 = vld [vmem:[#allocation10 + $0x30] sm:$0xff]   ;;  %v957_v38 = vld [vmem:[#allocation10 + $0x28] sm:$0xff]  }
  0x52   :  { %v958_v39 = vld [vmem:[#allocation10 + $0x20] sm:$0xff]   ;;  %v959_v40 = vld [vmem:[#allocation10 + $0x18] sm:$0xff]   ;;  %v960_v51 = vld [vmem:[#allocation10 + $0x10] sm:$0xff]  }
  0x53   :  { %822 = vmatpush3.bf16.msra.mxu0 %v932_v3  ;;  %842 = vmatpush3.bf16.msra.mxu1 %v941_v8  ;;  %v736_v41 = vld [vmem:[%s1302_s4] ss:$0 sm:$0xff]  ;;  %v961_v52 = vld [vmem:[#allocation10 + $0x8] sm:$0xff]   ;;  %v962_v53 = vld [vmem:[#allocation10] sm:$0xff]  }
  0x54   :  { %823 = vmatprep.subr.bf16.mxu0 %v1129_v0  ;;  %843 = vmatprep.subr.bf16.mxu1 %v1129_v0  ;;  %v963_v54 = vld [vmem:[#allocation11 + $0x38] sm:$0xff]   ;;  %v964_v55 = vld [vmem:[#allocation11 + $0x30] sm:$0xff]   ;;  %v965_v56 = vld [vmem:[#allocation11 + $0x28] sm:$0xff]  }
  0x55   :  { %v966_v57 = vld [vmem:[#allocation11 + $0x20] sm:$0xff]   ;;  %v967_v58 = vld [vmem:[#allocation11 + $0x18] sm:$0xff]   ;;  %v968_v6 = vld [vmem:[#allocation11 + $0x10] sm:$0xff]  }
  0x56   :  { %v745_v59 = vld [vmem:[%s1304_s6] ss:$0 sm:$0xff]  ;;  %v970_v8 = vld [vmem:[#allocation11] sm:$0xff]  }
  0x57   :  { %824 = vmatpush3.bf16.msra.mxu0 %v933_v5  ;;  %844 = vmatpush3.bf16.msra.mxu1 %v942_v10 }
  0x58   :  { %825 = vmatprep.subr.bf16.mxu0 %v1129_v0  ;;  %845 = vmatprep.subr.bf16.mxu1 %v1129_v0 }
  0x5b   :  { %826 = vmatpush3.bf16.msra.mxu0 %v934_v7  ;;  %846 = vmatpush3.bf16.msra.mxu1 %v943_v12  ;;  %v969_v7 = vld [vmem:[#allocation11 + $0x8] sm:$0xff]  }
  0x5c   :  { %827 = vmatprep.subr.bf16.mxu0 %v1129_v0  ;;  %847 = vmatprep.subr.bf16.mxu1 %v1129_v0 }
  0x5f   :  { %828 = vmatpush3.bf16.msra.mxu0 %v935_v9  ;;  %848 = vmatpush3.bf16.msra.mxu1 %v944_v15  ;;  %v754_v9 = vld [vmem:[%s1306_s8] ss:$0 sm:$0xff]  ;;  %s711_s8 = sshll.u32 %s1131_s12, 4  ;;  %s712_s8 = int_to_ptr.vmem [resolvable:$true] %s711_s8 }
  0x60   :  { %829 = vmatprep.subr.bf16.mxu0 %v1129_v0  ;;  %849 = vmatprep.subr.bf16.mxu1 %v1129_v0  ;;  %s1091_s13 = scalar_lea.vmem %s712_s8, 256  ;;  %p1096_p3 = scmp.lt.s32.totalorder %s712_s8, %s712_s8 }
  0x61   :  { %p1092_p2 = scmp.ne.s32.totalorder %s712_s8, %s1091_s13  ;;  %p1097_p4 = scmp.lt.s32.totalorder %s1091_s13, %s1091_s13 }
  0x63   :  { %830 = vmatpush3.bf16.msra.mxu0 %v936_v11  ;;  %850 = vmatpush3.bf16.msra.mxu1 %v945_v16  ;;  %p1098_p5 = por %p1097_p4, %p1096_p3 }
  0x64   :  { %831 = vmatprep.subr.bf16.mxu0 %v1129_v0  ;;  %851 = vmatprep.subr.bf16.mxu1 %v1129_v0 }
  0x65   :  { %p1099_p6 = pnand %p1098_p5, %p1092_p2 }
  0x67   :  { %832 = vmatpush3.bf16.msra.mxu0 %v937_v13  ;;  %852 = vmatpush3.bf16.msra.mxu1 %v946_v17 }
  0x68   :  { %857 = vmatprep.subr.bf16.mxu0 %v1129_v0  ;;  %877 = vmatprep.subr.bf16.mxu1 %v1129_v0 }
  0x6a   :  { %834 = vmatmul.mubr.bf16.vlgmr.msra.gmra.mxu0 %v938_v14 }
  0x6b   :  { %873 = vmatprep.mubr.msk.bf16.mxu0 %vm1130_vm0, %v1129_v0  ;;  %858 = vmatpush3.bf16.msra.mxu0 %v947_v18 }
  0x6c   :  { %859 = vmatprep.subr.bf16.mxu0 %v1129_v0 }
  0x6f   :  { %860 = vmatpush3.bf16.msra.mxu0 %v948_v19 }
  0x70   :  { %861 = vmatprep.subr.bf16.mxu0 %v1129_v0 }
  0x73   :  { %862 = vmatpush3.bf16.msra.mxu0 %v949_v20 }
  0x74   :  { %863 = vmatprep.subr.bf16.mxu0 %v1129_v0 }
  0x77   :  { %864 = vmatpush3.bf16.msra.mxu0 %v950_v21 }
  0x78   :  { %865 = vmatprep.subr.bf16.mxu0 %v1129_v0 }
  0x7b   :  { %866 = vmatpush3.bf16.msra.mxu0 %v951_v22 }
  0x7c   :  { %867 = vmatprep.subr.bf16.mxu0 %v1129_v0 }
  0x7f   :  { %868 = vmatpush3.bf16.msra.mxu0 %v952_v33 }
  0x80   :  { %869 = vmatprep.subr.bf16.mxu0 %v1129_v0 }
  0x83   :  { %870 = vmatpush3.bf16.msra.mxu0 %v953_v34 }
  0x84   :  { %871 = vmatprep.subr.bf16.mxu0 %v1129_v0 }
  0x87   :  { %872 = vmatpush3.bf16.msra.mxu0 %v954_v35 }
  0x88   :  { %897 = vmatprep.subr.bf16.mxu0 %v1129_v0 }
 0x12a   :  { %v235_v24 = vpop.f32.mrf.mxu0 }
 0x12b   :  { %v236_v26 = vadd.f32 %v726_v23, %v235_v24 }
 0x12c   :  { %v835_v25 = vpop.f32.mrf.mxu0 }
 0x12d   :  { %v242_v30 = vmax.f32 %v236_v26, 0.0 }
 0x12e   :  { %v238_v27 = vpop.f32.mrf.mxu0 }
 0x12f   :  { %v239_v28 = vadd.f32 %v726_v23, %v238_v27 }
 0x130   :  { %v836_v29 = vpop.f32.mrf.mxu0 }
 0x131   :  { %v243_v31 = vmax.f32 %v239_v28, 0.0 }
 0x133   :  { %v244_v32 = vpack.c.bf16 %v243_v31, %v242_v30 }
 0x135   :  { %854 = vmatmul.mubr.bf16.vlgmr.msra.gmra.mxu1 %v244_v32 }
 0x136   :  { %893 = vmatprep.mubr.msk.bf16.mxu1 %vm1130_vm0, %v1129_v0  ;;  %878 = vmatpush3.bf16.msra.mxu1 %v955_v36 }
 0x137   :  { %879 = vmatprep.subr.bf16.mxu1 %v1129_v0 }
 0x13a   :  { %880 = vmatpush3.bf16.msra.mxu1 %v956_v37 }
 0x13b   :  { %881 = vmatprep.subr.bf16.mxu1 %v1129_v0 }
 0x13e   :  { %882 = vmatpush3.bf16.msra.mxu1 %v957_v38 }
 0x13f   :  { %883 = vmatprep.subr.bf16.mxu1 %v1129_v0 }
 0x142   :  { %884 = vmatpush3.bf16.msra.mxu1 %v958_v39 }
 0x143   :  { %885 = vmatprep.subr.bf16.mxu1 %v1129_v0 }
 0x146   :  { %886 = vmatpush3.bf16.msra.mxu1 %v959_v40 }
 0x147   :  { %887 = vmatprep.subr.bf16.mxu1 %v1129_v0 }
 0x14a   :  { %888 = vmatpush3.bf16.msra.mxu1 %v960_v51 }
 0x14b   :  { %889 = vmatprep.subr.bf16.mxu1 %v1129_v0 }
 0x14e   :  { %890 = vmatpush3.bf16.msra.mxu1 %v961_v52 }
 0x14f   :  { %891 = vmatprep.subr.bf16.mxu1 %v1129_v0 }
 0x152   :  { %892 = vmatpush3.bf16.msra.mxu1 %v962_v53 }
 0x1f5   :  { %v350_v42 = vpop.f32.mrf.mxu1 }
 0x1f6   :  { %v351_v44 = vadd.f32 %v736_v41, %v350_v42 }
 0x1f7   :  { %v855_v43 = vpop.f32.mrf.mxu1 }
 0x1f8   :  { %v357_v48 = vmax.f32 %v351_v44, 0.0 }
 0x1f9   :  { %v353_v45 = vpop.f32.mrf.mxu1 }
 0x1fa   :  { %v354_v46 = vadd.f32 %v736_v41, %v353_v45 }
 0x1fb   :  { %v856_v47 = vpop.f32.mrf.mxu1 }
 0x1fc   :  { %v358_v49 = vmax.f32 %v354_v46, 0.0 }
 0x1fe   :  { %v359_v50 = vpack.c.bf16 %v358_v49, %v357_v48 }
 0x200   :  { %874 = vmatmul.mubr.bf16.vlgmr.msra.gmra.mxu0 %v359_v50 }
 0x201   :  { %913 = vmatprep.mubr.msk.bf16.mxu0 %vm1130_vm0, %v1129_v0  ;;  %898 = vmatpush3.bf16.msra.mxu0 %v963_v54 }
 0x202   :  { %899 = vmatprep.subr.bf16.mxu0 %v1129_v0 }
 0x205   :  { %900 = vmatpush3.bf16.msra.mxu0 %v964_v55 }
 0x206   :  { %901 = vmatprep.subr.bf16.mxu0 %v1129_v0 }
 0x209   :  { %902 = vmatpush3.bf16.msra.mxu0 %v965_v56 }
 0x20a   :  { %903 = vmatprep.subr.bf16.mxu0 %v1129_v0 }
 0x20d   :  { %904 = vmatpush3.bf16.msra.mxu0 %v966_v57 }
 0x20e   :  { %905 = vmatprep.subr.bf16.mxu0 %v1129_v0 }
 0x211   :  { %906 = vmatpush3.bf16.msra.mxu0 %v967_v58 }
 0x212   :  { %907 = vmatprep.subr.bf16.mxu0 %v1129_v0 }
 0x215   :  { %908 = vmatpush3.bf16.msra.mxu0 %v968_v6 }
 0x216   :  { %909 = vmatprep.subr.bf16.mxu0 %v1129_v0 }
 0x219   :  { %910 = vmatpush3.bf16.msra.mxu0 %v969_v7 }
 0x21a   :  { %911 = vmatprep.subr.bf16.mxu0 %v1129_v0  ;;  %v763_v0 = vld [vmem:[%s1308_s10] ss:$0 sm:$0xff] }
 0x21d   :  { %912 = vmatpush3.bf16.msra.mxu0 %v970_v8 }
 0x2c0   :  { %v465_v60 = vpop.f32.mrf.mxu0 }
 0x2c1   :  { %v466_v62 = vadd.f32 %v745_v59, %v465_v60 }
 0x2c2   :  { %v875_v61 = vpop.f32.mrf.mxu0 }
 0x2c3   :  { %v472_v3 = vmax.f32 %v466_v62, 0.0 }
 0x2c4   :  { %v468_v63 = vpop.f32.mrf.mxu0 }
 0x2c5   :  { %v469_v1 = vadd.f32 %v745_v59, %v468_v63 }
 0x2c6   :  { %v876_v2 = vpop.f32.mrf.mxu0 }
 0x2c7   :  { %v473_v4 = vmax.f32 %v469_v1, 0.0 }
 0x2c9   :  { %v474_v5 = vpack.c.bf16 %v473_v4, %v472_v3 }
 0x2cb   :  { %894 = vmatmul.mubr.bf16.vlgmr.msra.gmra.mxu1 %v474_v5 }
 0x38b   :  { %v580_v10 = vpop.f32.mrf.mxu1 }
 0x38c   :  { %v581_v12 = vadd.f32 %v754_v9, %v580_v10 }
 0x38d   :  { %v895_v11 = vpop.f32.mrf.mxu1 }
 0x38e   :  { %v587_v16 = vmax.f32 %v581_v12, 0.0 }
 0x38f   :  { %v583_v13 = vpop.f32.mrf.mxu1 }
 0x390   :  { %v584_v14 = vadd.f32 %v754_v9, %v583_v13 }
 0x391   :  { %v896_v15 = vpop.f32.mrf.mxu1 }
 0x392   :  { %v588_v17 = vmax.f32 %v584_v14, 0.0 }
 0x394   :  { %v589_v18 = vpack.c.bf16 %v588_v17, %v587_v16 }
 0x396   :  { %914 = vmatmul.mubr.bf16.vlgmr.msra.gmra.mxu0 %v589_v18 }
 0x456   :  { %v695_v19 = vpop.f32.mrf.mxu0 }
 0x457   :  { %v696_v20 = vadd.f32 %v763_v0, %v695_v19 }
 0x458   :  { %v915_v21 = vpop.f32.mrf.mxu0 }
 0x459   :  { %v702_v22 = vmax.f32 %v696_v20, 0.0 }
 0x45a   :  { %v698_v23 = vpop.f32.mrf.mxu0 }
 0x45b   :  { %704 = vst [vmem:[#allocation13] sm:$0xff] %v702_v22  ;;  %v699_v24 = vadd.f32 %v763_v0, %v698_v23 }
 0x45c   :  { %v916_v25 = vpop.f32.mrf.mxu0 }
 0x45d   :  { %v703_v26 = vmax.f32 %v699_v24, 0.0 }
 0x45f   :  { %705 = vst [vmem:[#allocation13 + $0x8] sm:$0xff] %v703_v26 }
 0x460   :  { %1102 = shalt.err (!%p1099_p6)
}
 0x461   :  { %s1132_s10 = smov 128   ;;  %s1133_s1 = smov 8  }
 0x462   :  { %717 = dma.vmem_to_hbm [thread:$0]  %s712_s8, 256, %s1309_s11, [#allocation4], %s1132_s10, %s1132_s10, %s1133_s1  }
 0x463   :  { %1119 = dma.done.wait [#allocation4], 256  }
 0x464   :  { %1120 = vsyncadd [#allocation4], 4294967040 }
 0x465   :  { %721 = vsyncpa [#allocation3], 1 }
 0x466   :  { %722 = vsyncpa [#allocation6], 1 }
 0x467   :  { %723 = vsyncpa [#allocation9], 1 }
 0x468   :  { %724 = vsyncpa [#allocation12], 1 }
 0x469   :  { %725 = vsyncpa [#allocation4], 1 }

// kernel: tpu_custom_call.1
= control target key start
LH: loop header
LB: loop body
LE: loop exit
PB: predicated region body
PF: predicated region fallthrough
CT: control target
= control target key end

     0   :  { %16 = vsyncpa [#allocation3], 0  ;;  %s1298_s0 = inlined_call_operand.hbm [shape: bf16[16,128], index: 0, kind: input, shape index: {}]   ;;  %s1299_s1 = inlined_call_operand.hbm [shape: bf16[128,128], index: 1, kind: input, shape index: {}]   ;;  %s1300_s2 = inlined_call_operand.vmem [shape: f32[1,128], index: 2, kind: input, shape index: {}]   ;;  %s1301_s3 = inlined_call_operand.hbm [shape: bf16[128,128], index: 3, kind: input, shape index: {}]   ;;  %s1302_s4 = inlined_call_operand.vmem [shape: f32[1,128], index: 4, kind: input, shape index: {}]   ;;  %s1303_s5 = inlined_call_operand.hbm [shape: bf16[128,128], index: 5, kind: input, shape index: {}]   ;;  %s1304_s6 = inlined_call_operand.vmem [shape: f32[1,128], index: 6, kind: input, shape index: {}]   ;;  %s1305_s7 = inlined_call_operand.hbm [shape: bf16[128,128], index: 7, kind: input, shape index: {}]   ;;  %s1306_s8 = inlined_call_operand.vmem [shape: f32[1,128], index: 8, kind: input, shape index: {}]   ;;  %s1307_s9 = inlined_call_operand.hbm [shape: bf16[128,128], index: 9, kind: input, shape index: {}]   ;;  %s1308_s10 = inlined_call_operand.vmem [shape: f32[1,128], index: 10, kind: input, shape index: {}]   ;;  %s1309_s11 = inlined_call_operand.hbm [shape: f32[16,128], index: 11, kind: output, shape index: {}]  }
   0x1   :  { %17 = vsyncpa [#allocation6], 0 }
   0x2   :  { %18 = vsyncpa [#allocation9], 0 }
   0x3   :  { %19 = vsyncpa [#allocation12], 0 }
   0x4   :  { %20 = vsyncpa [#allocation4], 0  ;;  %s1121_s17 = smov [#allocation5]   ;;  %s1122_s19 = smov [#allocation8]  }
   0x5   :  { %s38_s18 = sshll.u32 %s1121_s17, 4  ;;  %s66_s20 = sshll.u32 %s1122_s19, 4  ;;  %s39_s18 = int_to_ptr.vmem [resolvable:$true] %s38_s18  ;;  %s67_s20 = int_to_ptr.vmem [resolvable:$true] %s66_s20 }
   0x6   :  { %s979_s21 = scalar_lea.vmem %s39_s18, 1024  ;;  %p984_p1 = scmp.lt.s32.totalorder %s39_s18, %s39_s18 }
   0x7   :  { %p980_p0 = scmp.ne.s32.totalorder %s39_s18, %s979_s21  ;;  %p985_p2 = scmp.lt.s32.totalorder %s979_s21, %s979_s21 }
   0x9   :  { %p986_p3 = por %p985_p2, %p984_p1 }
   0xb   :  { %p987_p4 = pnand %p986_p3, %p980_p0 }
   0xd   :  { %990 = shalt.err (!%p987_p4)
}
   0xe   :  { %s1123_s22 = smov 64   ;;  %s1124_s23 = smov 4  }
   0xf   :  { %44 = dma.hbm_to_vmem [thread:$0]  %s1299_s1, 1024, %s39_s18, [#allocation6], %s1123_s22, %s1123_s22, %s1124_s23  }
  0x10   :  { %s999_s26 = scalar_lea.vmem %s67_s20, 1024  ;;  %p1004_p6 = scmp.lt.s32.totalorder %s67_s20, %s67_s20 }
  0x11   :  { %p1000_p5 = scmp.ne.s32.totalorder %s67_s20, %s999_s26  ;;  %p1005_p7 = scmp.lt.s32.totalorder %s999_s26, %s999_s26 }
  0x13   :  { %p1006_p8 = por %p1005_p7, %p1004_p6 }
  0x15   :  { %p1007_p9 = pnand %p1006_p8, %p1000_p5 }
  0x17   :  { %1010 = shalt.err (!%p1007_p9)
}
  0x18   :  { %72 = dma.hbm_to_vmem [thread:$0]  %s1303_s5, 1024, %s67_s20, [#allocation9], %s1123_s22, %s1123_s22, %s1124_s23  }
  0x19   :  { %s1125_s29 = smov [#allocation2]   ;;  %s1126_s12 = smov [#allocation7]  }
  0x1a   :  { %s26_s30 = sshll.u32 %s1125_s29, 4  ;;  %s52_s13 = sshll.u32 %s1126_s12, 4  ;;  %s27_s30 = int_to_ptr.vmem [resolvable:$true] %s26_s30  ;;  %s53_s13 = int_to_ptr.vmem [resolvable:$true] %s52_s13 }
  0x1b   :  { %s1019_s1 = scalar_lea.vmem %s27_s30, 128  ;;  %p1024_p11 = scmp.lt.s32.totalorder %s27_s30, %s27_s30 }
  0x1c   :  { %p1020_p10 = scmp.ne.s32.totalorder %s27_s30, %s1019_s1  ;;  %p1025_p12 = scmp.lt.s32.totalorder %s1019_s1, %s1019_s1 }
  0x1e   :  { %p1026_p13 = por %p1025_p12, %p1024_p11 }
  0x20   :  { %p1027_p0 = pnand %p1026_p13, %p1020_p10 }
  0x22   :  { %1030 = shalt.err (!%p1027_p0)
}
  0x23   :  { %32 = dma.hbm_to_vmem [thread:$0]  %s1298_s0, 128, %s27_s30, [#allocation3], %s1123_s22, %s1123_s22, %s1124_s23  }
  0x24   :  { %s1039_s5 = scalar_lea.vmem %s53_s13, 1024  ;;  %p1044_p2 = scmp.lt.s32.totalorder %s53_s13, %s53_s13 }
  0x25   :  { %p1040_p1 = scmp.ne.s32.totalorder %s53_s13, %s1039_s5  ;;  %p1045_p3 = scmp.lt.s32.totalorder %s1039_s5, %s1039_s5 }
  0x27   :  { %p1046_p4 = por %p1045_p3, %p1044_p2 }
  0x29   :  { %p1047_p5 = pnand %p1046_p4, %p1040_p1 }
  0x2b   :  { %1050 = shalt.err (!%p1047_p5)
}
  0x2c   :  { %58 = dma.hbm_to_vmem [thread:$0]  %s1301_s3, 1024, %s53_s13, [#allocation6], %s1123_s22, %s1123_s22, %s1124_s23  }
  0x2d   :  { %s1127_s18 = smov [#allocation10]   ;;  %s1128_s20 = smov [#allocation11]  }
  0x2e   :  { %s80_s19 = sshll.u32 %s1127_s18, 4  ;;  %s94_s21 = sshll.u32 %s1128_s20, 4  ;;  %s81_s19 = int_to_ptr.vmem [resolvable:$true] %s80_s19  ;;  %s95_s21 = int_to_ptr.vmem [resolvable:$true] %s94_s21 }
  0x2f   :  { %s1059_s0 = scalar_lea.vmem %s81_s19, 1024  ;;  %p1064_p7 = scmp.lt.s32.totalorder %s81_s19, %s81_s19 }
  0x30   :  { %p1060_p6 = scmp.ne.s32.totalorder %s81_s19, %s1059_s0  ;;  %p1065_p8 = scmp.lt.s32.totalorder %s1059_s0, %s1059_s0 }
  0x32   :  { %p1066_p9 = por %p1065_p8, %p1064_p7 }
  0x34   :  { %p1067_p10 = pnand %p1066_p9, %p1060_p6 }
  0x36   :  { %1070 = shalt.err (!%p1067_p10)
}
  0x37   :  { %86 = dma.hbm_to_vmem [thread:$0]  %s1305_s7, 1024, %s81_s19, [#allocation9], %s1123_s22, %s1123_s22, %s1124_s23  }
  0x38   :  { %s1079_s3 = scalar_lea.vmem %s95_s21, 1024  ;;  %p1084_p12 = scmp.lt.s32.totalorder %s95_s21, %s95_s21 }
  0x39   :  { %p1080_p11 = scmp.ne.s32.totalorder %s95_s21, %s1079_s3  ;;  %p1085_p13 = scmp.lt.s32.totalorder %s1079_s3, %s1079_s3 }
  0x3b   :  { %p1086_p0 = por %p1085_p13, %p1084_p12 }
  0x3d   :  { %p1087_p1 = pnand %p1086_p0, %p1080_p11 }
  0x3f   :  { %1090 = shalt.err (!%p1087_p1)
}
  0x40   :  { %100 = dma.hbm_to_vmem [thread:$0]  %s1307_s9, 1024, %s95_s21, [#allocation12], %s1123_s22, %s1123_s22, %s1124_s23  }
  0x41   :  { %1111 = dma.done.wait [#allocation3], 128  }
  0x42   :  { %1112 = vsyncadd [#allocation3], 4294967168 }
  0x43   :  { %1113 = dma.done.wait [#allocation6], 2048  }
  0x44   :  { %1114 = vsyncadd [#allocation6], 4294965248 }
  0x45   :  { %1115 = dma.done.wait [#allocation9], 2048  }
  0x46   :  { %1116 = vsyncadd [#allocation9], 4294965248 }
  0x47   :  { %1117 = dma.done.wait [#allocation12], 1024  }
  0x48   :  { %1118 = vsyncadd [#allocation12], 4294966272  ;;  %v1129_v0 = vmov 0.0   ;;  %vm1130_vm0 = vmmov 0   ;;  %v930_v1 = vld [vmem:[#allocation5 + $0x38] sm:$0xff]   ;;  %v931_v2 = vld [vmem:[#allocation5 + $0x30] sm:$0xff]  }
  0x49   :  { %817 = vmatprep.subr.bf16.mxu0 %v1129_v0  ;;  %833 = vmatprep.mubr.msk.bf16.mxu0 %vm1130_vm0, %v1129_v0  ;;  %v932_v3 = vld [vmem:[#allocation5 + $0x28] sm:$0xff]   ;;  %v939_v4 = vld [vmem:[#allocation7 + $0x38] sm:$0xff]   ;;  %v933_v5 = vld [vmem:[#allocation5 + $0x20] sm:$0xff]   ;;  %s1131_s12 = smov [#allocation13]  }
  0x4a   :  { %837 = vmatprep.subr.bf16.mxu1 %v1129_v0  ;;  %853 = vmatprep.mubr.msk.bf16.mxu1 %vm1130_vm0, %v1129_v0  ;;  %v940_v6 = vld [vmem:[#allocation7 + $0x30] sm:$0xff]   ;;  %v934_v7 = vld [vmem:[#allocation5 + $0x18] sm:$0xff]   ;;  %v941_v8 = vld [vmem:[#allocation7 + $0x28] sm:$0xff]  }
  0x4b   :  { %818 = vmatpush3.bf16.msra.mxu0 %v930_v1  ;;  %838 = vmatpush3.bf16.msra.mxu1 %v939_v4  ;;  %v935_v9 = vld [vmem:[#allocation5 + $0x10] sm:$0xff]   ;;  %v942_v10 = vld [vmem:[#allocation7 + $0x20] sm:$0xff]   ;;  %v936_v11 = vld [vmem:[#allocation5 + $0x8] sm:$0xff]  }
  0x4c   :  { %819 = vmatprep.subr.bf16.mxu0 %v1129_v0  ;;  %839 = vmatprep.subr.bf16.mxu1 %v1129_v0  ;;  %v943_v12 = vld [vmem:[#allocation7 + $0x18] sm:$0xff]   ;;  %v937_v13 = vld [vmem:[#allocation5] sm:$0xff]   ;;  %v944_v15 = vld [vmem:[#allocation7 + $0x10] sm:$0xff]  }
  0x4d   :  { %v938_v14 = vld [vmem:[#allocation2] sm:$0xff]   ;;  %v945_v16 = vld [vmem:[#allocation7 + $0x8] sm:$0xff]   ;;  %v946_v17 = vld [vmem:[#allocation7] sm:$0xff]  }
  0x4e   :  { %v947_v18 = vld [vmem:[#allocation8 + $0x38] sm:$0xff]   ;;  %v948_v19 = vld [vmem:[#allocation8 + $0x30] sm:$0xff]   ;;  %v949_v20 = vld [vmem:[#allocation8 + $0x28] sm:$0xff]  }
  0x4f   :  { %820 = vmatpush3.bf16.msra.mxu0 %v931_v2  ;;  %840 = vmatpush3.bf16.msra.mxu1 %v940_v6  ;;  %v950_v21 = vld [vmem:[#allocation8 + $0x20] sm:$0xff]   ;;  %v951_v22 = vld [vmem:[#allocation8 + $0x18] sm:$0xff]   ;;  %v952_v33 = vld [vmem:[#allocation8 + $0x10] sm:$0xff]  }
  0x50   :  { %821 = vmatprep.subr.bf16.mxu0 %v1129_v0  ;;  %841 = vmatprep.subr.bf16.mxu1 %v1129_v0  ;;  %v726_v23 = vld [vmem:[%s1300_s2] ss:$0 sm:$0xff]  ;;  %v953_v34 = vld [vmem:[#allocation8 + $0x8] sm:$0xff]   ;;  %v954_v35 = vld [vmem:[#allocation8] sm:$0xff]  }
  0x51   :  { %v955_v36 = vld [vmem:[#allocation10 + $0x38] sm:$0xff]   ;;  %v956_v37 = vld [vmem:[#allocation10 + $0x30] sm:$0xff]   ;;  %v957_v38 = vld [vmem:[#allocation10 + $0x28] sm:$0xff]  }
  0x52   :  { %v958_v39 = vld [vmem:[#allocation10 + $0x20] sm:$0xff]   ;;  %v959_v40 = vld [vmem:[#allocation10 + $0x18] sm:$0xff]   ;;  %v960_v51 = vld [vmem:[#allocation10 + $0x10] sm:$0xff]  }
  0x53   :  { %822 = vmatpush3.bf16.msra.mxu0 %v932_v3  ;;  %842 = vmatpush3.bf16.msra.mxu1 %v941_v8  ;;  %v736_v41 = vld [vmem:[%s1302_s4] ss:$0 sm:$0xff]  ;;  %v961_v52 = vld [vmem:[#allocation10 + $0x8] sm:$0xff]   ;;  %v962_v53 = vld [vmem:[#allocation10] sm:$0xff]  }
  0x54   :  { %823 = vmatprep.subr.bf16.mxu0 %v1129_v0  ;;  %843 = vmatprep.subr.bf16.mxu1 %v1129_v0  ;;  %v963_v54 = vld [vmem:[#allocation11 + $0x38] sm:$0xff]   ;;  %v964_v55 = vld [vmem:[#allocation11 + $0x30] sm:$0xff]   ;;  %v965_v56 = vld [vmem:[#allocation11 + $0x28] sm:$0xff]  }
  0x55   :  { %v966_v57 = vld [vmem:[#allocation11 + $0x20] sm:$0xff]   ;;  %v967_v58 = vld [vmem:[#allocation11 + $0x18] sm:$0xff]   ;;  %v968_v6 = vld [vmem:[#allocation11 + $0x10] sm:$0xff]  }
  0x56   :  { %v745_v59 = vld [vmem:[%s1304_s6] ss:$0 sm:$0xff]  ;;  %v970_v8 = vld [vmem:[#allocation11] sm:$0xff]  }
  0x57   :  { %824 = vmatpush3.bf16.msra.mxu0 %v933_v5  ;;  %844 = vmatpush3.bf16.msra.mxu1 %v942_v10 }
  0x58   :  { %825 = vmatprep.subr.bf16.mxu0 %v1129_v0  ;;  %845 = vmatprep.subr.bf16.mxu1 %v1129_v0 }
  0x5b   :  { %826 = vmatpush3.bf16.msra.mxu0 %v934_v7  ;;  %846 = vmatpush3.bf16.msra.mxu1 %v943_v12  ;;  %v969_v7 = vld [vmem:[#allocation11 + $0x8] sm:$0xff]  }
  0x5c   :  { %827 = vmatprep.subr.bf16.mxu0 %v1129_v0  ;;  %847 = vmatprep.subr.bf16.mxu1 %v1129_v0 }
  0x5f   :  { %828 = vmatpush3.bf16.msra.mxu0 %v935_v9  ;;  %848 = vmatpush3.bf16.msra.mxu1 %v944_v15  ;;  %v754_v9 = vld [vmem:[%s1306_s8] ss:$0 sm:$0xff]  ;;  %s711_s8 = sshll.u32 %s1131_s12, 4  ;;  %s712_s8 = int_to_ptr.vmem [resolvable:$true] %s711_s8 }
  0x60   :  { %829 = vmatprep.subr.bf16.mxu0 %v1129_v0  ;;  %849 = vmatprep.subr.bf16.mxu1 %v1129_v0  ;;  %s1091_s13 = scalar_lea.vmem %s712_s8, 256  ;;  %p1096_p3 = scmp.lt.s32.totalorder %s712_s8, %s712_s8 }
  0x61   :  { %p1092_p2 = scmp.ne.s32.totalorder %s712_s8, %s1091_s13  ;;  %p1097_p4 = scmp.lt.s32.totalorder %s1091_s13, %s1091_s13 }
  0x63   :  { %830 = vmatpush3.bf16.msra.mxu0 %v936_v11  ;;  %850 = vmatpush3.bf16.msra.mxu1 %v945_v16  ;;  %p1098_p5 = por %p1097_p4, %p1096_p3 }
  0x64   :  { %831 = vmatprep.subr.bf16.mxu0 %v1129_v0  ;;  %851 = vmatprep.subr.bf16.mxu1 %v1129_v0 }
  0x65   :  { %p1099_p6 = pnand %p1098_p5, %p1092_p2 }
  0x67   :  { %832 = vmatpush3.bf16.msra.mxu0 %v937_v13  ;;  %852 = vmatpush3.bf16.msra.mxu1 %v946_v17 }
  0x68   :  { %857 = vmatprep.subr.bf16.mxu0 %v1129_v0  ;;  %877 = vmatprep.subr.bf16.mxu1 %v1129_v0 }
  0x6a   :  { %834 = vmatmul.mubr.bf16.vlgmr.msra.gmra.mxu0 %v938_v14 }
  0x6b   :  { %873 = vmatprep.mubr.msk.bf16.mxu0 %vm1130_vm0, %v1129_v0  ;;  %858 = vmatpush3.bf16.msra.mxu0 %v947_v18 }
  0x6c   :  { %859 = vmatprep.subr.bf16.mxu0 %v1129_v0 }
  0x6f   :  { %860 = vmatpush3.bf16.msra.mxu0 %v948_v19 }
  0x70   :  { %861 = vmatprep.subr.bf16.mxu0 %v1129_v0 }
  0x73   :  { %862 = vmatpush3.bf16.msra.mxu0 %v949_v20 }
  0x74   :  { %863 = vmatprep.subr.bf16.mxu0 %v1129_v0 }
  0x77   :  { %864 = vmatpush3.bf16.msra.mxu0 %v950_v21 }
  0x78   :  { %865 = vmatprep.subr.bf16.mxu0 %v1129_v0 }
  0x7b   :  { %866 = vmatpush3.bf16.msra.mxu0 %v951_v22 }
  0x7c   :  { %867 = vmatprep.subr.bf16.mxu0 %v1129_v0 }
  0x7f   :  { %868 = vmatpush3.bf16.msra.mxu0 %v952_v33 }
  0x80   :  { %869 = vmatprep.subr.bf16.mxu0 %v1129_v0 }
  0x83   :  { %870 = vmatpush3.bf16.msra.mxu0 %v953_v34 }
  0x84   :  { %871 = vmatprep.subr.bf16.mxu0 %v1129_v0 }
  0x87   :  { %872 = vmatpush3.bf16.msra.mxu0 %v954_v35 }
  0x88   :  { %897 = vmatprep.subr.bf16.mxu0 %v1129_v0 }
 0x12a   :  { %v235_v24 = vpop.f32.mrf.mxu0 }
 0x12b   :  { %v236_v26 = vadd.f32 %v726_v23, %v235_v24 }
 0x12c   :  { %v835_v25 = vpop.f32.mrf.mxu0 }
 0x12d   :  { %v242_v30 = vmax.f32 %v236_v26, 0.0 }
 0x12e   :  { %v238_v27 = vpop.f32.mrf.mxu0 }
 0x12f   :  { %v239_v28 = vadd.f32 %v726_v23, %v238_v27 }
 0x130   :  { %v836_v29 = vpop.f32.mrf.mxu0 }
 0x131   :  { %v243_v31 = vmax.f32 %v239_v28, 0.0 }
 0x133   :  { %v244_v32 = vpack.c.bf16 %v243_v31, %v242_v30 }
 0x135   :  { %854 = vmatmul.mubr.bf16.vlgmr.msra.gmra.mxu1 %v244_v32 }
 0x136   :  { %893 = vmatprep.mubr.msk.bf16.mxu1 %vm1130_vm0, %v1129_v0  ;;  %878 = vmatpush3.bf16.msra.mxu1 %v955_v36 }
 0x137   :  { %879 = vmatprep.subr.bf16.mxu1 %v1129_v0 }
 0x13a   :  { %880 = vmatpush3.bf16.msra.mxu1 %v956_v37 }
 0x13b   :  { %881 = vmatprep.subr.bf16.mxu1 %v1129_v0 }
 0x13e   :  { %882 = vmatpush3.bf16.msra.mxu1 %v957_v38 }
 0x13f   :  { %883 = vmatprep.subr.bf16.mxu1 %v1129_v0 }
 0x142   :  { %884 = vmatpush3.bf16.msra.mxu1 %v958_v39 }
 0x143   :  { %885 = vmatprep.subr.bf16.mxu1 %v1129_v0 }
 0x146   :  { %886 = vmatpush3.bf16.msra.mxu1 %v959_v40 }
 0x147   :  { %887 = vmatprep.subr.bf16.mxu1 %v1129_v0 }
 0x14a   :  { %888 = vmatpush3.bf16.msra.mxu1 %v960_v51 }
 0x14b   :  { %889 = vmatprep.subr.bf16.mxu1 %v1129_v0 }
 0x14e   :  { %890 = vmatpush3.bf16.msra.mxu1 %v961_v52 }
 0x14f   :  { %891 = vmatprep.subr.bf16.mxu1 %v1129_v0 }
 0x152   :  { %892 = vmatpush3.bf16.msra.mxu1 %v962_v53 }
 0x1f5   :  { %v350_v42 = vpop.f32.mrf.mxu1 }
 0x1f6   :  { %v351_v44 = vadd.f32 %v736_v41, %v350_v42 }
 0x1f7   :  { %v855_v43 = vpop.f32.mrf.mxu1 }
 0x1f8   :  { %v357_v48 = vmax.f32 %v351_v44, 0.0 }
 0x1f9   :  { %v353_v45 = vpop.f32.mrf.mxu1 }
 0x1fa   :  { %v354_v46 = vadd.f32 %v736_v41, %v353_v45 }
 0x1fb   :  { %v856_v47 = vpop.f32.mrf.mxu1 }
 0x1fc   :  { %v358_v49 = vmax.f32 %v354_v46, 0.0 }
 0x1fe   :  { %v359_v50 = vpack.c.bf16 %v358_v49, %v357_v48 }
 0x200   :  { %874 = vmatmul.mubr.bf16.vlgmr.msra.gmra.mxu0 %v359_v50 }
 0x201   :  { %913 = vmatprep.mubr.msk.bf16.mxu0 %vm1130_vm0, %v1129_v0  ;;  %898 = vmatpush3.bf16.msra.mxu0 %v963_v54 }
 0x202   :  { %899 = vmatprep.subr.bf16.mxu0 %v1129_v0 }
 0x205   :  { %900 = vmatpush3.bf16.msra.mxu0 %v964_v55 }
 0x206   :  { %901 = vmatprep.subr.bf16.mxu0 %v1129_v0 }
 0x209   :  { %902 = vmatpush3.bf16.msra.mxu0 %v965_v56 }
 0x20a   :  { %903 = vmatprep.subr.bf16.mxu0 %v1129_v0 }
 0x20d   :  { %904 = vmatpush3.bf16.msra.mxu0 %v966_v57 }
 0x20e   :  { %905 = vmatprep.subr.bf16.mxu0 %v1129_v0 }
 0x211   :  { %906 = vmatpush3.bf16.msra.mxu0 %v967_v58 }
 0x212   :  { %907 = vmatprep.subr.bf16.mxu0 %v1129_v0 }
 0x215   :  { %908 = vmatpush3.bf16.msra.mxu0 %v968_v6 }
 0x216   :  { %909 = vmatprep.subr.bf16.mxu0 %v1129_v0 }
 0x219   :  { %910 = vmatpush3.bf16.msra.mxu0 %v969_v7 }
 0x21a   :  { %911 = vmatprep.subr.bf16.mxu0 %v1129_v0  ;;  %v763_v0 = vld [vmem:[%s1308_s10] ss:$0 sm:$0xff] }
 0x21d   :  { %912 = vmatpush3.bf16.msra.mxu0 %v970_v8 }
 0x2c0   :  { %v465_v60 = vpop.f32.mrf.mxu0 }
 0x2c1   :  { %v466_v62 = vadd.f32 %v745_v59, %v465_v60 }
 0x2c2   :  { %v875_v61 = vpop.f32.mrf.mxu0 }
 0x2c3   :  { %v472_v3 = vmax.f32 %v466_v62, 0.0 }
 0x2c4   :  { %v468_v63 = vpop.f32.mrf.mxu0 }
 0x2c5   :  { %v469_v1 = vadd.f32 %v745_v59, %v468_v63 }
 0x2c6   :  { %v876_v2 = vpop.f32.mrf.mxu0 }
 0x2c7   :  { %v473_v4 = vmax.f32 %v469_v1, 0.0 }
 0x2c9   :  { %v474_v5 = vpack.c.bf16 %v473_v4, %v472_v3 }
 0x2cb   :  { %894 = vmatmul.mubr.bf16.vlgmr.msra.gmra.mxu1 %v474_v5 }
 0x38b   :  { %v580_v10 = vpop.f32.mrf.mxu1 }
 0x38c   :  { %v581_v12 = vadd.f32 %v754_v9, %v580_v10 }
 0x38d   :  { %v895_v11 = vpop.f32.mrf.mxu1 }
 0x38e   :  { %v587_v16 = vmax.f32 %v581_v12, 0.0 }
 0x38f   :  { %v583_v13 = vpop.f32.mrf.mxu1 }
 0x390   :  { %v584_v14 = vadd.f32 %v754_v9, %v583_v13 }
 0x391   :  { %v896_v15 = vpop.f32.mrf.mxu1 }
 0x392   :  { %v588_v17 = vmax.f32 %v584_v14, 0.0 }
 0x394   :  { %v589_v18 = vpack.c.bf16 %v588_v17, %v587_v16 }
 0x396   :  { %914 = vmatmul.mubr.bf16.vlgmr.msra.gmra.mxu0 %v589_v18 }
 0x456   :  { %v695_v19 = vpop.f32.mrf.mxu0 }
 0x457   :  { %v696_v20 = vadd.f32 %v763_v0, %v695_v19 }
 0x458   :  { %v915_v21 = vpop.f32.mrf.mxu0 }
 0x459   :  { %v702_v22 = vmax.f32 %v696_v20, 0.0 }
 0x45a   :  { %v698_v23 = vpop.f32.mrf.mxu0 }
 0x45b   :  { %704 = vst [vmem:[#allocation13] sm:$0xff] %v702_v22  ;;  %v699_v24 = vadd.f32 %v763_v0, %v698_v23 }
 0x45c   :  { %v916_v25 = vpop.f32.mrf.mxu0 }
 0x45d   :  { %v703_v26 = vmax.f32 %v699_v24, 0.0 }
 0x45f   :  { %705 = vst [vmem:[#allocation13 + $0x8] sm:$0xff] %v703_v26 }
 0x460   :  { %1102 = shalt.err (!%p1099_p6)
}
 0x461   :  { %s1132_s10 = smov 128   ;;  %s1133_s1 = smov 8  }
 0x462   :  { %717 = dma.vmem_to_hbm [thread:$0]  %s712_s8, 256, %s1309_s11, [#allocation4], %s1132_s10, %s1132_s10, %s1133_s1  }
 0x463   :  { %1119 = dma.done.wait [#allocation4], 256  }
 0x464   :  { %1120 = vsyncadd [#allocation4], 4294967040 }
 0x465   :  { %721 = vsyncpa [#allocation3], 1 }
 0x466   :  { %722 = vsyncpa [#allocation6], 1 }
 0x467   :  { %723 = vsyncpa [#allocation9], 1 }
 0x468   :  { %724 = vsyncpa [#allocation12], 1 }
 0x469   :  { %725 = vsyncpa [#allocation4], 1 }

</bundles_post_ra>
